<compile_context>
chip_gen: v7x
topology: tpu7x:2x2x1
jax: 0.10.0
libtpu: 0.0.40
codegen_flags: <defaults>
</compile_context>

<pallas_src>
import functools
import math

import jax
import jax.numpy as jnp
from jax.experimental import pallas as pl
from jax.experimental.pallas import tpu as pltpu

INF_VAL = 10000.0
_VMEM_LIMIT = 48 * 1024 * 1024   # scoped-VMEM cap; safe on v5e/v6e (128 MiB) and v7x (64 MiB)


def _round_up(x, m):
    return (x + m - 1) // m * m


def _tile_and_pad(total, preferred):
    """Return (tile, padded_total): tile is a multiple of 8 dividing padded_total.

    Prefers an exact divisor of `total` (no padding); otherwise pads `total` up to a
    multiple of `preferred` so an odd/prime length never forces one giant VMEM tile."""
    if total <= preferred:
        t = _round_up(max(total, 8), 8)
        return t, t
    for t in range(preferred, 127, -8):          # largest exact multiple-of-8 divisor
        if total % t == 0:
            return t, total
    return preferred, _round_up(total, preferred)


def _divisor_tile(total, preferred):
    """Largest multiple-of-8 tile <= preferred that divides `total` (a multiple of 8)."""
    if total <= preferred:
        return total
    for t in range(preferred, 7, -8):
        if total % t == 0:
            return t
    return total


# ---------------------------------------------------------------------------
# Stage 1: projection that emits head-split (B, n_slabs, T, d_k) directly.
# ---------------------------------------------------------------------------
def _qkv_proj_kernel(x_ref, w_ref, b_ref, o_ref):
    d_k = o_ref.shape[3]
    # Dense full-width MXU matmul (N = F_out), f32 accumulation.
    y = jnp.dot(x_ref[0], w_ref[...], preferred_element_type=jnp.float32)
    y = (y + b_ref[...].astype(jnp.float32)).astype(o_ref.dtype)
    # Scatter the per-head d_k column slabs into the head-split output block:
    # the head split never becomes a separate XLA op / HBM round trip.
    for g in range(o_ref.shape[1]):
        o_ref[0, g] = y[:, g * d_k:(g + 1) * d_k]


def _qkv_proj(x, w, b, *, d_k, block_t, out_dtype):
    """x: (B, Tp, F_in); w: (F_in, n_slabs*d_k); b: (1, n_slabs*d_k) f32.
    Returns (B, n_slabs, Tp, d_k) -- the head-split projection."""
    B, Tp, F_in = x.shape
    F_out = w.shape[1]
    n_slabs = F_out // d_k
    grid = (B, Tp // block_t)

    flops = 2 * B * Tp * F_in * F_out
    bytes_accessed = (x.size * x.dtype.itemsize + w.size * w.dtype.itemsize
                      + b.size * b.dtype.itemsize
                      + B * Tp * F_out * jnp.dtype(out_dtype).itemsize)

    return pl.pallas_call(
        _qkv_proj_kernel,
        out_shape=jax.ShapeDtypeStruct((B, n_slabs, Tp, d_k), out_dtype),
        grid_spec=pltpu.PrefetchScalarGridSpec(
            num_scalar_prefetch=0,
            grid=grid,
            in_specs=[
                pl.BlockSpec((1, block_t, F_in), lambda bi, ti: (bi, ti, 0)),
                # Grid-invariant weight / bias (constant index_map -> fetched once).
                # TODO(synk): single-buffer via pipeline_mode=pl.Buffered(1) on v7x
                # (64 MiB VMEM) once that path is validated in this JAX version.
                pl.BlockSpec((F_in, F_out), lambda bi, ti: (0, 0)),
                pl.BlockSpec((1, F_out), lambda bi, ti: (0, 0)),
            ],
            out_specs=pl.BlockSpec((1, n_slabs, block_t, d_k),
                                   lambda bi, ti: (bi, 0, ti, 0)),
        ),
        compiler_params=pltpu.CompilerParams(
            dimension_semantics=("parallel", "parallel"),
            vmem_limit_bytes=_VMEM_LIMIT),
        cost_estimate=pl.CostEstimate(
            flops=flops, transcendentals=0, bytes_accessed=bytes_accessed),
    )(x, w, b)


# ---------------------------------------------------------------------------
# Stage 2: flash attention (online softmax) fused with the output projection.
# ---------------------------------------------------------------------------
def _flash_mha_kernel(q_ref, k_ref, v_ref, mask_ref, wo_ref, bo_ref, out_ref,
                      m_sc, l_sc, acc_sc, *, approx_recip):
    ki = pl.program_id(2)

    @pl.when(ki == 0)
    def _init():
        m_sc[...] = jnp.full(m_sc.shape, -jnp.inf, m_sc.dtype)
        l_sc[...] = jnp.zeros(l_sc.shape, l_sc.dtype)
        acc_sc[...] = jnp.zeros(acc_sc.shape, acc_sc.dtype)

    q = q_ref[0]                                    # (H, tq, d_k); sm_scale folded into Wq/bq
    k = k_ref[0]                                    # (H, tk, d_k)
    v = v_ref[0]                                    # (H, tk, d_k)
    masked = (mask_ref[0] != 0)[None, :, :]         # (1, tq, tk)  True == drop

    # Per-head scores; contraction over d_k on both sides -> no k.T materialized.
    s = jax.lax.dot_general(q, k, (((2,), (2,)), ((0,), (0,))),
                            preferred_element_type=jnp.float32)        # (H, tq, tk) f32
    s = jnp.where(masked, -INF_VAL, s)              # single per-step select

    # Online softmax update, all in f32.
    m_prev = m_sc[...]                              # (H, tq, 1)
    m_new = jnp.maximum(m_prev, jnp.max(s, axis=-1, keepdims=True))
    alpha = jnp.exp(m_prev - m_new)
    # exp(-INF_VAL - m_new) underflows to exactly 0 in f32 whenever the row has a
    # live key, so no second `where(masked, 0, p)` pass is needed per step; rows
    # with no live key at all are zeroed once in _finalize.
    p = jnp.exp(s - m_new)                          # (H, tq, tk)
    l_sc[...] = alpha * l_sc[...] + jnp.sum(p, axis=-1, keepdims=True)
    pv = jax.lax.dot_general(p.astype(v.dtype), v, (((2,), (1,)), ((0,), (0,))),
                             preferred_element_type=jnp.float32)       # (H, tq, d_k)
    acc_sc[...] = alpha * acc_sc[...] + pv
    m_sc[...] = m_new

    @pl.when(ki == pl.num_programs(2) - 1)
    def _finalize():
        # Fully-masked rows (running max still exactly -INF_VAL): the reference
        # zeroes them via masked_fill(attn, 0.0) -> zero context.
        dead = m_sc[...] == -INF_VAL                                    # (H, tq, 1)
        ctx = jnp.where(dead, 0.0,
                        acc_sc[...] * pl.reciprocal(l_sc[...], approx=approx_recip))
        # Fused output projection: one batched-over-heads dot + sum (no unrolled
        # per-head matmul / add chain).
        out = jax.lax.dot_general(ctx.astype(wo_ref.dtype), wo_ref[...],
                                  (((2,), (1,)), ((0,), (0,))),
                                  preferred_element_type=jnp.float32)  # (H, tq, F)
        out = jnp.sum(out, axis=0) + bo_ref[...].astype(jnp.float32)
        out_ref[0] = out.astype(out_ref.dtype)


# ---------------------------------------------------------------------------
# Public wrapper (eval-mode forward; no cache / pos_emb path)
# ---------------------------------------------------------------------------
def multi_head_attention(query, key, value, mask, params, *, n_head,
                         compute_dtype=jnp.bfloat16,
                         q_tile=256, kv_tile=256, proj_tile=512):
    """query: (B, T1, F); key/value: (B, T2, F); mask: (B, T1, T2), True = masked out."""
    B, T1, F = query.shape
    T2 = key.shape[1]
    assert F % n_head == 0
    d_k = F // n_head
    sm_scale = 1.0 / math.sqrt(d_k)
    cdt = jnp.dtype(compute_dtype)

    wq, bq, wk, bk, wv, bv, wo, bo = params

    # Tile sizes + padded sequence lengths (guards against odd / prime T blowing VMEM).
    tq, T1p = _tile_and_pad(T1, q_tile)
    tk, T2p = _tile_and_pad(T2, kv_tile)

    self_attn = (query is key) and (key is value)
    if self_attn:
        T1p = T2p = max(T1p, T2p)
        tq = _divisor_tile(T1p, q_tile)
        tk = _divisor_tile(T2p, kv_tile)

    def pad_time(x, tp):
        t = x.shape[1]
        return x if tp == t else jnp.pad(x, ((0, 0), (0, tp - t), (0, 0)))

    # Stage 1: projections emitting head-split (B, H, T, d_k) directly.
    # sm_scale is folded into Wq / bq so stage 2 never rescales the score tensor.
    if self_attn:
        w_all = jnp.concatenate([wq * sm_scale, wk, wv], axis=1).astype(cdt)   # (F, 3F)
        b_all = jnp.concatenate([bq * sm_scale, bk, bv], axis=1).astype(jnp.float32)
        x_p = pad_time(query, T1p).astype(cdt)
        qkv = _qkv_proj(x_p, w_all, b_all, d_k=d_k,
                        block_t=_divisor_tile(T1p, proj_tile), out_dtype=cdt)
        q_arr = k_arr = v_arr = qkv              # (B, 3H, Tp, d_k)
        q_off, k_off, v_off = 0, 1, 2            # head-group block offsets (units of H)
    else:
        q_arr = _qkv_proj(pad_time(query, T1p).astype(cdt),
                          (wq * sm_scale).astype(cdt),
                          (bq * sm_scale).astype(jnp.float32),
                          d_k=d_k, block_t=_divisor_tile(T1p, proj_tile), out_dtype=cdt)
        k_arr = _qkv_proj(pad_time(key, T2p).astype(cdt), wk.astype(cdt),
                          bk.astype(jnp.float32),
                          d_k=d_k, block_t=_divisor_tile(T2p, proj_tile), out_dtype=cdt)
        v_arr = _qkv_proj(pad_time(value, T2p).astype(cdt), wv.astype(cdt),
                          bv.astype(jnp.float32),
                          d_k=d_k, block_t=_divisor_tile(T2p, proj_tile), out_dtype=cdt)
        q_off, k_off, v_off = 0, 0, 0

    # Dense mask; padded kv columns / q rows are marked masked.
    if (T1p, T2p) != (T1, T2):
        mask = jnp.pad(mask, ((0, 0), (0, T1p - T1), (0, T2p - T2)),
                       constant_values=True)
    mask_i8 = mask.astype(jnp.int8)

    wo3 = wo.reshape(n_head, d_k, F).astype(cdt)     # row h*d_k + j  <->  [h, j, :]
    bo_f = bo.astype(jnp.float32)

    grid = (B, T1p // tq, T2p // tk)

    def qkv_spec(rows, off, is_q):
        if is_q:
            return pl.BlockSpec((1, n_head, rows, d_k),
                                lambda b, qi, ki: (b, off, qi, 0))
        return pl.BlockSpec((1, n_head, rows, d_k),
                            lambda b, qi, ki: (b, off, ki, 0))

    kernel = functools.partial(_flash_mha_kernel,
                               approx_recip=(cdt != jnp.float32))

    it = jnp.dtype(cdt).itemsize
    flops = 4 * B * T1p * T2p * F + 2 * B * T1p * F * F
    bytes_accessed = (B * n_head * (T1p + 2 * T2p) * d_k * it
                      + B * T1p * T2p
                      + wo3.size * it + bo_f.size * 4
                      + B * T1p * F * jnp.dtype(query.dtype).itemsize)

    out = pl.pallas_call(
        kernel,
        out_shape=jax.ShapeDtypeStruct((B, T1p, F), query.dtype),
        grid_spec=pltpu.PrefetchScalarGridSpec(
            num_scalar_prefetch=0,
            grid=grid,
            in_specs=[
                qkv_spec(tq, q_off, True),
                qkv_spec(tk, k_off, False),
                qkv_spec(tk, v_off, False),
                pl.BlockSpec((1, tq, tk), lambda b, qi, ki: (b, qi, ki)),
                # Grid-invariant Wo / bo (constant index_map -> fetched once).
                # TODO(synk): single-buffer via pipeline_mode=pl.Buffered(1) on v7x.
                pl.BlockSpec((n_head, d_k, F), lambda b, qi, ki: (0, 0, 0)),
                pl.BlockSpec((1, F), lambda b, qi, ki: (0, 0)),
            ],
            out_specs=pl.BlockSpec((1, tq, F), lambda b, qi, ki: (b, qi, 0)),
            scratch_shapes=[
                pltpu.VMEM((n_head, tq, 1), jnp.float32),    # running max
                pltpu.VMEM((n_head, tq, 1), jnp.float32),    # running denominator
                pltpu.VMEM((n_head, tq, d_k), jnp.float32),  # un-normalized context
            ],
        ),
        compiler_params=pltpu.CompilerParams(
            # batch / q-tiles shard across TensorCores; kv carries the online-softmax state.
            dimension_semantics=("parallel", "parallel", "arbitrary"),
            vmem_limit_bytes=_VMEM_LIMIT),
        cost_estimate=pl.CostEstimate(
            flops=flops,
            transcendentals=B * n_head * T1p * T2p,
            bytes_accessed=bytes_accessed),
    )(q_arr, k_arr, v_arr, mask_i8, wo3, bo_f)

    return out if T1p == T1 else out[:, :T1, :]


# ---------------------------------------------------------------------------
# Pure-JAX reference mirroring the PyTorch forward (eval mode, no cache).
# ---------------------------------------------------------------------------
def _reference(query, key, value, mask, params, *, n_head):
    wq, bq, wk, bk, wv, bv, wo, bo = params
    B, T1, F = query.shape
    d_k = F // n_head

    def split(x):
        b_, t_, _ = x.shape
        return x.reshape(b_, t_, n_head, d_k).transpose(0, 2, 1, 3)

    q = split(query @ wq + bq)
    k = split(key @ wk + bk)
    v = split(value @ wv + bv)

    scores = jnp.einsum("bhqd,bhkd->bhqk", q, k) / math.sqrt(d_k)
    m = mask[:, None, :, :]
    scores = jnp.where(m, -INF_VAL, scores)
    attn = jax.nn.softmax(scores, axis=-1)
    attn = jnp.where(m, 0.0, attn)
    x = jnp.einsum("bhqk,bhkd->bhqd", attn, v)
    x = x.transpose(0, 2, 1, 3).reshape(B, T1, F)
    return x @ wo + bo


if __name__ == "__main__":
    # Small shapes consistent with the module: n_feat=32, n_head=4, d_k=8.
    B, T1, T2, F, H = 2, 8, 8, 32, 4

    key0 = jax.random.PRNGKey(0)
    ks = jax.random.split(key0, 12)
    bound = 1.0 / math.sqrt(F)   # PyTorch nn.Linear default init range

    def uinit(k, shape):
        return jax.random.uniform(k, shape, jnp.float32, -bound, bound)

    # Weights stored as (in_feat, out_feat) so the projection is x @ W + b.
    params = (
        uinit(ks[0], (F, F)), uinit(ks[1], (1, F)),   # Wq, bq
        uinit(ks[2], (F, F)), uinit(ks[3], (1, F)),   # Wk, bk
        uinit(ks[4], (F, F)), uinit(ks[5], (1, F)),   # Wv, bv
        uinit(ks[6], (F, F)), uinit(ks[7], (1, F)),   # Wo, bo
    )

    query = jax.random.normal(ks[8], (B, T1, F), jnp.float32)
    key_in = jax.random.normal(ks[9], (B, T2, F), jnp.float32)
    value = jax.random.normal(ks[10], (B, T2, F), jnp.float32)
    mask = jax.random.bernoulli(ks[11], p=0.25, shape=(B, T1, T2))  # True = masked
    mask = mask.at[0, 0, :].set(True)   # one fully-masked row -> exercises dead-row path

    ref = _reference(query, key_in, value, mask, params, n_head=H)

    # 1) f32 MXU path: tight check that the flash/online-softmax algorithm is exact.
    out_f32 = jax.block_until_ready(
        multi_head_attention(query, key_in, value, mask, params,
                             n_head=H, compute_dtype=jnp.float32))
    assert out_f32.shape == (B, T1, F)
    assert jnp.allclose(out_f32, ref, atol=1e-4, rtol=1e-4), "f32 mismatch vs reference"

    # 2) bf16 production path (bf16 MXU operands, f32 accumulation); reference is
    #    pure f32, so the tolerance only reflects bf16 input rounding.
    out_bf16 = jax.block_until_ready(
        multi_head_attention(query, key_in, value, mask, params,
                             n_head=H, compute_dtype=jnp.bfloat16))
    max_err = float(jnp.max(jnp.abs(out_bf16 - ref)))
    assert max_err < 2e-1, f"bf16 mismatch vs reference (max abs err {max_err})"

    # 3) fused-QKV self-attention path (query is key is value).
    ref_sa = _reference(query, query, query, mask, params, n_head=H)
    out_sa = jax.block_until_ready(
        multi_head_attention(query, query, query, mask, params,
                             n_head=H, compute_dtype=jnp.float32))
    assert jnp.allclose(out_sa, ref_sa, atol=1e-4, rtol=1e-4), "self-attn mismatch"

    # 4) padded path: sequence lengths that are not multiples of 8.
    T1o, T2o = 10, 12
    q2 = jax.random.normal(ks[8], (B, T1o, F), jnp.float32)
    k2 = jax.random.normal(ks[9], (B, T2o, F), jnp.float32)
    v2 = jax.random.normal(ks[10], (B, T2o, F), jnp.float32)
    m2 = jax.random.bernoulli(ks[11], p=0.25, shape=(B, T1o, T2o))
    ref2 = _reference(q2, k2, v2, m2, params, n_head=H)
    out2 = jax.block_until_ready(
        multi_head_attention(q2, k2, v2, m2, params,
                             n_head=H, compute_dtype=jnp.float32))
    assert out2.shape == (B, T1o, F)
    assert jnp.allclose(out2, ref2, atol=1e-4, rtol=1e-4), "padded-path mismatch"

    print("KERNEL_OK")
</pallas_src>

<mosaic_0001>
module attributes {stable_mosaic.version = 11 : i64} {
  func.func @_qkv_proj_kernel(%arg0: i32, %arg1: i32, %arg2: memref<1x8x32xf32, #tpu.memory_space<vmem>>, %arg3: memref<32x32xf32, #tpu.memory_space<vmem>>, %arg4: memref<1x32xf32, #tpu.memory_space<vmem>>, %arg5: memref<1x4x8x8xf32, #tpu.memory_space<vmem>>) attributes {dimension_semantics = [#tpu.dimension_semantics<parallel>, #tpu.dimension_semantics<parallel>], iteration_bounds = array<i64: 2, 1>, scalar_prefetch = 0 : i64, scratch_operands = 0 : i64, tpu.core_type = #tpu.core_type<tc>, window_params = [{transform_indices = @transform_0, window_bounds = array<i64: 1, 8, 32>}, {pipeline_mode = #tpu.pipeline_mode<synchronous>, transform_indices = @transform_1, window_bounds = array<i64: 32, 32>}, {pipeline_mode = #tpu.pipeline_mode<synchronous>, transform_indices = @transform_2, window_bounds = array<i64: 1, 32>}, {transform_indices = @transform_3, window_bounds = array<i64: 1, 4, 8, 8>}]} {
    %c0 = arith.constant 0 : index
    %c0_0 = arith.constant 0 : index
    %c0_1 = arith.constant 0 : index
    %0 = vector.load %arg2[%c0, %c0_0, %c0_1] : memref<1x8x32xf32, #tpu.memory_space<vmem>>, vector<1x8x32xf32>
    %1 = vector.shape_cast %0 : vector<1x8x32xf32> to vector<8x32xf32>
    %c0_2 = arith.constant 0 : index
    %c0_3 = arith.constant 0 : index
    %2 = vector.load %arg3[%c0_2, %c0_3] : memref<32x32xf32, #tpu.memory_space<vmem>>, vector<32x32xf32>
    %cst = arith.constant dense<0.000000e+00> : vector<8x32xf32>
    %3 = tpu.matmul %1, %2, %cst {dimension_numbers = #tpu.dot_dimension_numbers<[1], [0], [0], [1], [0, 0, 1, 1], [], []>} : vector<8x32xf32>, vector<32x32xf32>, vector<8x32xf32> -> vector<8x32xf32>
    %c0_4 = arith.constant 0 : index
    %c0_5 = arith.constant 0 : index
    %4 = vector.load %arg4[%c0_4, %c0_5] : memref<1x32xf32, #tpu.memory_space<vmem>>, vector<1x32xf32>
    %5 = vector.broadcast %4 : vector<1x32xf32> to vector<8x32xf32>
    %6 = arith.addf %3, %5 : vector<8x32xf32>
    %7 = vector.extract_strided_slice %6 {offsets = [0, 0], sizes = [8, 8], strides = [1, 1]} : vector<8x32xf32> to vector<8x8xf32>
    %c0_6 = arith.constant 0 : index
    %c0_7 = arith.constant 0 : index
    %c0_8 = arith.constant 0 : index
    %c0_9 = arith.constant 0 : index
    %8 = vector.load %arg5[%c0_6, %c0_7, %c0_8, %c0_9] : memref<1x4x8x8xf32, #tpu.memory_space<vmem>>, vector<1x1x8x8xf32>
    %9 = vector.shape_cast %8 : vector<1x1x8x8xf32> to vector<8x8xf32>
    %10 = vector.shape_cast %7 : vector<8x8xf32> to vector<1x1x8x8xf32>
    tpu.vector_store %arg5[%c0_6, %c0_7, %c0_8, %c0_9], %10 {strides = array<i32>} : memref<1x4x8x8xf32, #tpu.memory_space<vmem>>, vector<1x1x8x8xf32>,
    %11 = vector.extract_strided_slice %6 {offsets = [0, 8], sizes = [8, 8], strides = [1, 1]} : vector<8x32xf32> to vector<8x8xf32>
    %c0_10 = arith.constant 0 : index
    %c1 = arith.constant 1 : index
    %c0_11 = arith.constant 0 : index
    %c0_12 = arith.constant 0 : index
    %12 = vector.load %arg5[%c0_10, %c1, %c0_11, %c0_12] : memref<1x4x8x8xf32, #tpu.memory_space<vmem>>, vector<1x1x8x8xf32>
    %13 = vector.shape_cast %12 : vector<1x1x8x8xf32> to vector<8x8xf32>
    %14 = vector.shape_cast %11 : vector<8x8xf32> to vector<1x1x8x8xf32>
    tpu.vector_store %arg5[%c0_10, %c1, %c0_11, %c0_12], %14 {strides = array<i32>} : memref<1x4x8x8xf32, #tpu.memory_space<vmem>>, vector<1x1x8x8xf32>,
    %15 = vector.extract_strided_slice %6 {offsets = [0, 16], sizes = [8, 8], strides = [1, 1]} : vector<8x32xf32> to vector<8x8xf32>
    %c0_13 = arith.constant 0 : index
    %c2 = arith.constant 2 : index
    %c0_14 = arith.constant 0 : index
    %c0_15 = arith.constant 0 : index
    %16 = vector.load %arg5[%c0_13, %c2, %c0_14, %c0_15] : memref<1x4x8x8xf32, #tpu.memory_space<vmem>>, vector<1x1x8x8xf32>
    %17 = vector.shape_cast %16 : vector<1x1x8x8xf32> to vector<8x8xf32>
    %18 = vector.shape_cast %15 : vector<8x8xf32> to vector<1x1x8x8xf32>
    tpu.vector_store %arg5[%c0_13, %c2, %c0_14, %c0_15], %18 {strides = array<i32>} : memref<1x4x8x8xf32, #tpu.memory_space<vmem>>, vector<1x1x8x8xf32>,
    %19 = vector.extract_strided_slice %6 {offsets = [0, 24], sizes = [8, 8], strides = [1, 1]} : vector<8x32xf32> to vector<8x8xf32>
    %c0_16 = arith.constant 0 : index
    %c3 = arith.constant 3 : index
    %c0_17 = arith.constant 0 : index
    %c0_18 = arith.constant 0 : index
    %20 = vector.load %arg5[%c0_16, %c3, %c0_17, %c0_18] : memref<1x4x8x8xf32, #tpu.memory_space<vmem>>, vector<1x1x8x8xf32>
    %21 = vector.shape_cast %20 : vector<1x1x8x8xf32> to vector<8x8xf32>
    %22 = vector.shape_cast %19 : vector<8x8xf32> to vector<1x1x8x8xf32>
    tpu.vector_store %arg5[%c0_16, %c3, %c0_17, %c0_18], %22 {strides = array<i32>} : memref<1x4x8x8xf32, #tpu.memory_space<vmem>>, vector<1x1x8x8xf32>,
    return
  }
  func.func @transform_0(%arg0: i32, %arg1: i32) -> (i32, i32, i32) {
    %c0_i32 = arith.constant 0 : i32
    %c0_i32_0 = arith.constant 0 : i32
    return %arg0, %arg1, %c0_i32 : i32, i32, i32
  }
  func.func @transform_1(%arg0: i32, %arg1: i32) -> (i32, i32) {
    %c0_i32 = arith.constant 0 : i32
    %c0_i32_0 = arith.constant 0 : i32
    %c0_i32_1 = arith.constant 0 : i32
    return %c0_i32, %c0_i32_0 : i32, i32
  }
  func.func @transform_2(%arg0: i32, %arg1: i32) -> (i32, i32) {
    %c0_i32 = arith.constant 0 : i32
    %c0_i32_0 = arith.constant 0 : i32
    %c0_i32_1 = arith.constant 0 : i32
    return %c0_i32, %c0_i32_0 : i32, i32
  }
  func.func @transform_3(%arg0: i32, %arg1: i32) -> (i32, i32, i32, i32) {
    %c0_i32 = arith.constant 0 : i32
    %c0_i32_0 = arith.constant 0 : i32
    %c0_i32_1 = arith.constant 0 : i32
    return %arg0, %c0_i32, %arg1, %c0_i32_0 : i32, i32, i32, i32
  }
}

</mosaic_0001>

<bundles_post_ra>
// kernel: tpu_custom_call.1
= control target key start
LH: loop header
LB: loop body
LE: loop exit
PB: predicated region body
PF: predicated region fallthrough
CT: control target
= control target key end

     0   :  { %8 = vsyncpa [#allocation3], 0  ;;  %s961_s0 = inlined_call_operand.hbm [shape: f32[2,8,32], index: 0, kind: input, shape index: {}]   ;;  %s962_s1 = inlined_call_operand.hbm [shape: f32[32,32], index: 1, kind: input, shape index: {}]   ;;  %s963_s2 = inlined_call_operand.vmem [shape: f32[1,32], index: 2, kind: input, shape index: {}]   ;;  %s964_s3 = inlined_call_operand.hbm [shape: f32[2,4,8,8], index: 3, kind: output, shape index: {}]  }
   0x1   :  { %10 = vsyncpa [#allocation3 + $0x1], 0 }
   0x2   :  { %11 = vsyncpa [#allocation6], 0 }
   0x3   :  { %12 = vsyncpa [#allocation4], 0 }
   0x4   :  { %14 = vsyncpa [#allocation4 + $0x1], 0  ;;  %s737_s12 = smov 0   ;;  %s739_s13 = smov 0  }
   0x5   :  { %s741_s14 = smov 0   ;;  %s743_s15 = smov 0  }
   0x6   :  { %s745_s16 = smov 0   ;;  %s747_s17 = smov 0  }
   0x7 LB: > { %s431_s18 = sadd.s32 4294967295, %s702_s17   ;;  %s432_s19 = sadd.s32 4294967294, %s702_s17   ;;  %s702_s17 = sphi %s747_s17, %s20_s17   ;;  %s698_s16 = sphi %s745_s16, %s988_s16   ;;  %s694_s15 = sphi %s743_s15, %s987_s15   ;;  %s690_s14 = sphi %s741_s14, %s986_s14   ;;  %s686_s13 = sphi %s739_s13, %s985_s13   ;;  %s682_s12 = sphi %s737_s12, %s984_s12  }
   0x8   : > { %p54_p0 = scmp.ne.s32.totalorder %s686_s13, %s682_s12  ;;  %p771_p1 = scmp.eq.s32.totalorder %s431_s18, 0 }
   0x9   : > { %p775_p2 = scmp.eq.s32.totalorder %s431_s18, 1  ;;  %p128_p3 = scmp.eq.s32.totalorder %s432_s19, 1 }
   0xa   : > { %s969_s20 = scalar_select %p771_p1, 1, 0 }
   0xb   : > { %s970_s21 = scalar_select %p775_p2, 1, 0 }
   0xc   : > { %p781_p4 = por %p771_p1, %p54_p0  ;;  %p433_p5 = scmp.ge.s32.totalorder %s702_s17, 1 }
   0xd   : > { %p786_p6 = por %p128_p3, %p54_p0  ;;  %p135_p7 = scmp.lt.s32.totalorder %s702_s17, 3 }
   0xe   : > { %s971_s22 = scalar_select %p781_p4, 1, 0 }
   0xf   : > { %s972_s23 = scalar_select %p786_p6, 1, 0 }
  0x10   : > { %p791_p8 = pnand %p433_p5, %p135_p7  ;;  %s704_s25 = smov [#allocation5]  }
  0x11   : > { %s147_s26 = sshll.u32 %s704_s25, 4  ;;  %s32_s28 = sadd.s32 1, %s698_s16  ;;  %s148_s26 = int_to_ptr.vmem [resolvable:$true] %s147_s26 }
  0x12   : > { %s973_s24 = scalar_select %p791_p8, 1, 0 }
  0x13   : > { %p483_p9 = pneg %p791_p8  ;;  %s558_s4 = scalar_lea.hbm %s962_s1, 512 }
  0x14   : > { %p559_p12 = scmp.ne.s32.totalorder %s962_s1, %s558_s4  ;;  %p565_p5 = scmp.lt.u32.totalorder %s558_s4, %s962_s1 }
  0x15   : > { %p800_p11 = pnand %p483_p9, %p771_p1 }
  0x17   : > { %p560_p13 = pneg %p800_p11 }
  0x19   : > { %p561_p0 = pnand %p560_p13, %p559_p12 }
  0x1b   : > { %p562_p3 = pneg %p561_p0 }
  0x1d   : > { %p567_p7 = pnand %p565_p5, %p562_p3 }
  0x1f   : > { %570 = shalt.err (!%p567_p7)
}
  0x20   : > { %s571_s9 = scalar_lea.vmem %s148_s26, 512  ;;  %p579_p1 = scmp.lt.s32.totalorder %s148_s26, %s148_s26 }
  0x21   : > { %p572_p9 = scmp.ne.s32.totalorder %s148_s26, %s571_s9  ;;  %p580_p4 = scmp.lt.s32.totalorder %s571_s9, %s571_s9 }
  0x23   : > { %p574_p10 = pnand %p572_p9, %p560_p13  ;;  %p581_p8 = por %p580_p4, %p579_p1 }
  0x25   : > { %p575_p6 = pneg %p574_p10 }
  0x27   : > { %p582_p2 = pnand %p581_p8, %p575_p6 }
  0x29   : > { %585 = shalt.err (!%p582_p2)
}
  0x2a   : > { %s705_s10 = smov 128   ;;  %s706_s11 = smov 8  }
  0x2b   : > { %486 = dma.hbm_to_vmem [thread:$0]  (!%p800_p11), %s962_s1, 512, %s148_s26, [#allocation6], %s705_s10, %s705_s10, %s706_s11  }
  0x2c   : > { %p34_p1 = scmp.ge.s32.totalorder %s32_s28, 2  ;;  %s41_s25 = sadd.s32 1, %s690_s14 }
  0x2d   : > { %p48_p2 = scmp.ne.s32.totalorder %s690_s14, %s686_s13  ;;  %p49_p4 = scmp.eq.s32.totalorder %s702_s17, 0 }
  0x2e   : > { %s990_s28 = smov (%p34_p1, %s32_s28), 0  ;;  %p976_p8 = scmp.ne.s32.totalorder %s970_s21, 0 }
  0x2f   : > { %p827_p6 = por %p49_p4, %p48_p2  ;;  %s36_s27 = ssub.s32 %s698_s16, %s990_s28 }
  0x30   : > { %p833_p10 = por %p976_p8, %p48_p2  ;;  %p496_p12 = scmp.lt.s32.totalorder %s702_s17, 2 }
  0x31   : > { %p39_p11 = scmp.eq.s32.totalorder %s36_s27, 0  ;;  %s164_s26 = sand.u32 1, %s690_s14  }
  0x32   : > { %s436_s4 = sshll.u32 %s164_s26, 3  ;;  %s437_s6 = sshll.u32 %s698_s16, 7 }
  0x33   : > { %s842_s5 = scalar_select %p39_p11, %s690_s14, %s41_s25  }
  0x34   : > { %s848_s9 = scalar_lea.hbm %s961_s0, %s437_s6  ;;  %s168_s21 = scalar_lea.vmem [#allocation2], %s436_s4 }
  0x35   : > { %s176_s10 = sshll.u32 %s168_s21, 4  ;;  %p854_p13 = pnand %p496_p12, %p827_p6  ;;  %s850_s10 = int_to_ptr.vmem [resolvable:$true] %s176_s10 }
  0x36   : > { %s165_s18 = scalar_lea.sflag [#allocation3], %s164_s26  ;;  %s586_s19 = scalar_lea.hbm %s848_s9, 128 }
  0x37   : > { %p587_p0 = scmp.ne.s32.totalorder %s848_s9, %s586_s19  ;;  %p588_p3 = pneg %p854_p13 }
  0x38   : > { %s591_s4 = scalar_lea.hbm %s961_s0, 256  ;;  %p592_p9 = scmp.lt.u32.totalorder %s848_s9, %s961_s0 }
  0x39   : > { %p589_p5 = pnand %p588_p3, %p587_p0  ;;  %p593_p1 = scmp.lt.u32.totalorder %s591_s4, %s586_s19 }
  0x3a   : > { %p595_p4 = scmp.lt.u32.totalorder %s586_s19, %s848_s9 }
  0x3b   : > { %p590_p7 = pneg %p589_p5  ;;  %p594_p2 = por %p593_p1, %p592_p9 }
  0x3d   : > { %p596_p6 = por %p595_p4, %p594_p2 }
  0x3f   : > { %p597_p8 = pnand %p596_p6, %p590_p7 }
  0x41   : > { %600 = shalt.err (!%p597_p8)
}
  0x42   : > { %s601_s26 = scalar_lea.vmem %s850_s10, 128  ;;  %s707_s7 = smov [#allocation2]  }
  0x43   : > { %p602_p12 = scmp.ne.s32.totalorder %s850_s10, %s601_s26  ;;  %s606_s8 = sshll.u32 %s707_s7, 4  ;;  %s607_s8 = int_to_ptr.vmem [resolvable:$false] %s606_s8 }
  0x44   : > { %s608_s21 = scalar_lea.vmem %s607_s8, 256  ;;  %p609_p5 = scmp.lt.s32.totalorder %s850_s10, %s607_s8 }
  0x45   : > { %p604_p11 = pnand %p602_p12, %p588_p3  ;;  %p610_p9 = scmp.lt.s32.totalorder %s608_s21, %s601_s26 }
  0x47   : > { %p605_p0 = pneg %p604_p11  ;;  %p611_p1 = por %p610_p9, %p609_p5 }
  0x49   : > { %p612_p2 = pnand %p611_p1, %p605_p0 }
  0x4b   : > { %615 = shalt.err (!%p612_p2)
}
  0x4c   : > { %490 = dma.hbm_to_vmem [thread:$0]  (!%p854_p13), %s848_s9, 128, %s850_s10, %s165_s18  }
  0x4d   : > { %p979_p7 = scmp.ne.s32.totalorder %s973_s24, 0 }
  0x4e   : > { %s886_s19 = sand.u32 (!%p979_p7), 1, %s686_s13   ;;  %p980_p3 = scmp.ne.s32.totalorder (!%p979_p7), %s971_s22, 0 }
  0x4f   : > { %185 = sbr.rel (%p979_p7) target bundleno = 449 (0x1c1), region = 32  ;;  %s439_s25 = sshll.u32 (!%p979_p7), %s886_s19, 3 }
  0x50   : > { %s188_s27 = scalar_lea.sflag (!%p979_p7), [#allocation3], %s886_s19  ;;  %s191_s4 = scalar_lea.vmem (!%p979_p7), [#allocation2], %s439_s25 }
  0x56   : > { %669 = dma.done.wait (%p980_p3), %s188_s27, 128  }
  0x57   : > { %671 = vsyncadd (%p980_p3), %s188_s27, 4294967168  ;;  %p981_p4 = scmp.ne.s32.totalorder %s969_s20, 0 }
  0x59   : > { %673 = dma.done.wait (%p981_p4), [#allocation6], 512  }
  0x5a   : > { %675 = vsyncadd (%p981_p4), [#allocation6], 4294966784  ;;  %v708_v0 = vmov 0.0|0.0   ;;  %vm709_vm0 = vmmov 0   ;;  %v710_v1 = vmov 0.0   ;;  %v219_v2 = vld [vmem:[#allocation5] sm:$0xff] }
  0x5b   : > { %469 = vmatprep.subr.bf16.mxu0 %v708_v0  ;;  %466 = vmatprep.mubr.msk.f32.mxu0 %vm709_vm0, %v710_v1  ;;  %v220_v3 = vld [vmem:[#allocation5 + $0x8] sm:$0xff]  ;;  %v221_v4 = vld [vmem:[#allocation5 + $0x10] sm:$0xff]  ;;  %v222_v6 = vld [vmem:[#allocation5 + $0x18] sm:$0xff]  ;;  %vm230_vm1 = vcmask 261120   ;;  %s441_s20 = sshll.u32 %s886_s19, 5  ;;  %vm304_vm2 = vcmask 64512  }
  0x5c   : > { %v470_v5 = vpack.c.bf16 %v220_v3, %v219_v2  ;;  %v473_v7 = vpack.c.bf16 %v222_v6, %v221_v4  ;;  %v218_v8 = vld [vmem:[%s191_s4] sm:$0xff]  ;;  %s711_s9 = smov 104   ;;  %s712_s10 = smov 120  }
  0x5d   : > { %v442_v9 = vld [vmem:[%s963_s2] ss:$0 sm:$0xff]  ;;  %s217_s11 = scalar_lea.vmem [#allocation7], %s441_s20  ;;  %s713_s18 = smov 112  }
  0x5e   : > { %471 = vmatpush3.bf16.msra.mxu0 %v470_v5  ;;  %s337_s29 = sshll.u32 %s217_s11, 4  ;;  %s452_s6 = sshll.u32 %s694_s15, 9  ;;  %s904_s29 = int_to_ptr.vmem [resolvable:$true] %s337_s29 }
  0x5f   : > { %472 = vmatprep.subr.bf16.mxu0 %v708_v0  ;;  %s911_s8 = scalar_lea.hbm %s964_s3, %s452_s6  ;;  %s323_s15 = scalar_lea.sflag [#allocation4], %s886_s19 }
  0x60   : > { %s616_s21 = scalar_lea.vmem %s904_s29, 512  ;;  %s714_s25 = smov [#allocation7]  }
  0x61   : > { %p617_p13 = scmp.ne.s32.totalorder %s904_s29, %s616_s21  ;;  %s620_s27 = sshll.u32 %s714_s25, 4  ;;  %s621_s27 = int_to_ptr.vmem [resolvable:$false] %s620_s27 }
  0x62   : > { %474 = vmatpush3.bf16.msra.mxu0 %v473_v7  ;;  %s622_s4 = scalar_lea.vmem %s621_s27, 1024  ;;  %p623_p12 = scmp.lt.s32.totalorder %s904_s29, %s621_s27 }
  0x63   : > { %p618_p6 = pnand %p617_p13, %p833_p10  ;;  %p624_p11 = scmp.lt.s32.totalorder %s622_s4, %s616_s21 }
  0x65   : > { %467 = vmatmul.mubr.msk.f32.vlgmr.msra.gmra.mrb[0].mxu0 %vm230_vm1, %v218_v8  ;;  %p619_p8 = pneg %p618_p6  ;;  %p625_p0 = por %p624_p11, %p623_p12 }
  0x67   : > { %p626_p5 = pnand %p625_p0, %p619_p8 }
 0x138   : > { %v300_v10 = vpop.f32.mrb[0].mxu0 }
 0x139   : > { %v301_v11 = vadd.f32 %v442_v9, %v300_v10  ;;  %v468_v12 = vpop.f32.mrb[1].mxu0 }
 0x13b   : > { %317 = vrot.lane.b32.xlu1 %v301_v11, %s711_s9  ;;  %307 = vrot.lane.b32.xlu0 %v301_v11, %s712_s10  ;;  %305 = vst.msk [vmem:[%s217_s11] sm:$0xff] %vm304_vm2, %v301_v11 }
 0x13f   : > { %312 = vrot.lane.b32.xlu0 %v301_v11, %s713_s18 }
 0x1ad   : > { %v318_v13 = vpop.permute.xlu1 %317  ;;  %v308_v14 = vpop.permute.xlu0 %307 }
 0x1ae   : > { %446 = vst.msk [vmem:[%s217_s11 + $0x18] sm:$0xff] %vm304_vm2, %v318_v13  ;;  %444 = vst.msk [vmem:[%s217_s11 + $0x8] sm:$0xff] %vm304_vm2, %v308_v14 }
 0x1b1   : > { %v313_v15 = vpop.permute.xlu0 %312 }
 0x1b2   : > { %445 = vst.msk [vmem:[%s217_s11 + $0x10] sm:$0xff] %vm304_vm2, %v313_v15 }
 0x1b3   : > { %629 = shalt.err (!%p626_p5)
}
 0x1b4   : > { %s630_s20 = scalar_lea.hbm %s911_s8, 512  ;;  %s634_s9 = scalar_lea.hbm %s964_s3, 1024 }
 0x1b5   : > { %p631_p9 = scmp.ne.s32.totalorder %s911_s8, %s630_s20  ;;  %p635_p7 = scmp.lt.u32.totalorder %s911_s8, %s964_s3 }
 0x1b6   : > { %p636_p3 = scmp.lt.u32.totalorder %s634_s9, %s630_s20  ;;  %p638_p13 = scmp.lt.u32.totalorder %s630_s20, %s911_s8 }
 0x1b7   : > { %p632_p1 = pnand %p631_p9, %p833_p10 }
 0x1b8   : > { %p637_p4 = por %p636_p3, %p635_p7 }
 0x1b9   : > { %p633_p2 = pneg %p632_p1 }
 0x1ba   : > { %p639_p6 = por %p638_p13, %p637_p4 }
 0x1bc   : > { %p640_p8 = pnand %p639_p6, %p633_p2 }
 0x1be   : > { %643 = shalt.err (!%p640_p8)
}
 0x1bf   : > { %s715_s18 = smov 128   ;;  %s716_s6 = smov 8  }
 0x1c0   : > { %481 = dma.vmem_to_hbm [thread:$0]  (%p833_p10), %s904_s29, 512, %s911_s8, %s323_s15, %s715_s18, %s715_s18, %s716_s6  }
 0x1c1 PF: > { %s352_s26 = sand.u32 1, %s682_s12   ;;  %p982_p12 = scmp.ne.s32.totalorder %s972_s23, 0 }
 0x1c2   : > { %p983_p11 = scmp.ge.s32.totalorder %s702_s17, 2  ;;  %s353_s7 = scalar_lea.sflag [#allocation4], %s352_s26 }
 0x1c4   : > { %p492_p0 = pnand %p983_p11, %p982_p12 }
 0x1c6   : > { %677 = dma.done.wait (!%p492_p0), %s353_s7, 512  }
 0x1c7   : > { %679 = vsyncadd (!%p492_p0), %s353_s7, 4294966784  ;;  %s20_s17 = sadd.s32 1, %s702_s17   ;;  %s984_s12 = smov %s686_s13 }
 0x1c8   : > { %p17_p5 = scmp.ge.s32.totalorder %s20_s17, 4   ;;  %s985_s13 = smov %s690_s14 }
 0x1c9   : > { %s986_s14 = smov %s842_s5  ;;  %s987_s15 = smov %s698_s16 }
 0x1ca   : > { %s988_s16 = smov %s990_s28  ;;  %19 = sbr.rel (!%p17_p5) target bundleno = 7 (0x7), region = 84 }
 0x1d1   :  { %358 = vsyncpa [#allocation3], 1 }
 0x1d2   :  { %360 = vsyncpa [#allocation3 + $0x1], 1 }
 0x1d3   :  { %361 = vsyncpa [#allocation6], 1 }
 0x1d4   :  { %362 = vsyncpa [#allocation4], 1 }
 0x1d5   :  { %364 = vsyncpa [#allocation4 + $0x1], 1 }

</bundles_post_ra>
